<compile_context>
chip_gen: v5e
topology: v5e:2x2
jax: 0.10.0
libtpu: 0.0.40
codegen_flags: <defaults>
</compile_context>

<pallas_src>
import functools
import math

import jax
import jax.numpy as jnp
from jax.experimental import pallas as pl
from jax.experimental.pallas import tpu as pltpu


def _gaussian_wavelet_kernel(x_ref, o_ref, *, compute_dtype):
    # 2 VPU muls + negate, exp -> EUP slot; nowhere near any VLIW slot limit,
    # the step is bounded by the HBM DMA of the in/out tiles.
    x = x_ref[...].astype(compute_dtype)
    o_ref[...] = (-x * jnp.exp(x * x * (-0.5))).astype(o_ref.dtype)


_MIN_PIPELINE_BYTES = 1 << 20  # below this, a single block is fine
_MIN_GRID_STEPS = 4            # >= 2 * num_TCs (v7x) -> pipeline + both cores busy


def _sublane_quantum(itemsize: int) -> int:
    if itemsize >= 4:
        return 8
    if itemsize == 2:
        return 16
    return 32


def _device_kind() -> str:
    try:
        return jax.devices()[0].device_kind.lower()
    except Exception:
        return ""


def _is_old_gen(kind: str) -> bool:
    return any(t in kind for t in ("v2", "v3", "v4", "v5"))


def _target_block_bytes(kind: str) -> int:
    # 4 MiB blocks on v6e/v7x: in+out double-buffered = 16 MiB, inside the
    # 32 MiB default scoped VMEM. Stay at 2 MiB on v5e (16 MiB default scope).
    return (2 if _is_old_gen(kind) else 4) * 1024 * 1024


def _compute_dtype(dtype, kind: str):
    # Native bf16 on v6e/v7x (bf16 VPU + EUP); f32 elsewhere, and always f32
    # for fp16 (x*x overflows) / other narrow dtypes.
    if dtype == jnp.bfloat16 and not _is_old_gen(kind):
        return jnp.bfloat16
    return jnp.float32


@jax.jit
def gaussian_wavelet(x: jax.Array) -> jax.Array:
    """Elementwise -x*exp(-x^2/2) computed in a Pallas TPU kernel."""
    orig_shape = x.shape
    dtype = x.dtype
    if x.size == 0:
        return x

    itemsize = jnp.dtype(dtype).itemsize
    kind = _device_kind()
    target_bytes = _target_block_bytes(kind)
    compute_dtype = _compute_dtype(dtype, kind)
    sub_q = _sublane_quantum(itemsize)

    # Collapse ONLY the leading dims; the native last dim stays the lane dim,
    # so this reshape (and its inverse below) never forces an XLA relayout
    # copy around the pallas_call.
    if x.ndim >= 2:
        rows = math.prod(orig_shape[:-1])
        cols = orig_shape[-1]
    elif x.ndim == 1:
        rows, cols = 1, orig_shape[0]
    else:
        rows, cols = 1, 1
    slab = jnp.reshape(x, (rows, cols))

    # Lane (last-dim) blocking: only when the last dim is a multiple of 128
    # and too wide for a single target-sized block. Otherwise take it whole —
    # a block last dim equal to the full array dim is always legal.
    if cols % 128 == 0:
        max_lanes = max(128, (target_bytes // max(1, sub_q * itemsize)) // 128 * 128)
        if cols <= max_lanes:
            tc = cols
        else:
            tc = 128
            cand = max_lanes
            while cand >= 128:
                if cols % cand == 0:
                    tc = cand
                    break
                cand -= 128
        lane_grid = cols // tc
    else:
        # TODO(synk): a non-128-multiple last dim is taken as one full-width
        # block; pathologically wide single rows (>~VMEM per row) unhandled.
        tc = cols
        lane_grid = 1

    # Row (sublane) blocking: ~target-sized blocks, multiples of the sublane
    # quantum; Pallas masks the partial last block (masked lanes are discarded).
    rows_per_block = max(sub_q, (target_bytes // max(1, tc * itemsize)) // sub_q * sub_q)
    tr = rows if rows <= rows_per_block else rows_per_block

    # Keep the double-buffered pipeline (and both v7x TensorCores) busy once
    # the array exceeds ~1 MiB: guarantee a few grid steps.
    total_bytes = rows * cols * itemsize
    if total_bytes > _MIN_PIPELINE_BYTES and lane_grid * pl.cdiv(rows, tr) < _MIN_GRID_STEPS:
        want_row_blocks = pl.cdiv(_MIN_GRID_STEPS, lane_grid)
        tr_cap = max(sub_q, (rows // want_row_blocks) // sub_q * sub_q)
        tr = min(tr, tr_cap)

    row_grid = pl.cdiv(rows, tr)

    kernel = functools.partial(_gaussian_wavelet_kernel, compute_dtype=compute_dtype)

    out_slab = pl.pallas_call(
        kernel,
        out_shape=jax.ShapeDtypeStruct((rows, cols), dtype),
        grid_spec=pltpu.PrefetchScalarGridSpec(
            num_scalar_prefetch=0,
            grid=(row_grid, lane_grid),
            in_specs=[pl.BlockSpec((tr, tc), lambda i, j: (i, j))],
            out_specs=pl.BlockSpec((tr, tc), lambda i, j: (i, j)),
        ),
        compiler_params=pltpu.CompilerParams(
            # Keep default 2-deep buffers; spend VMEM on larger blocks instead.
            dimension_semantics=("parallel", "parallel"),  # megacore on v7x
        ),
        cost_estimate=pl.CostEstimate(
            flops=3 * rows * cols,
            transcendentals=rows * cols,
            bytes_accessed=2 * rows * cols * itemsize,
        ),
    )(slab)

    return jnp.reshape(out_slab, orig_shape)


def _reference(x):
    return -1.0 * x * jnp.exp(x * x * (-0.5))


if __name__ == "__main__":
    key = jax.random.PRNGKey(0)

    # Small NCHW input consistent with an elementwise activation module.
    x = jax.random.normal(key, (2, 4, 16, 16), dtype=jnp.float32)
    y = gaussian_wavelet(x)
    jax.block_until_ready(y)
    y_ref = _reference(x)
    assert y.shape == x.shape and y.dtype == x.dtype
    assert jnp.allclose(y, y_ref, atol=1e-6, rtol=1e-6), "f32 mismatch vs reference"

    # Also exercise the 128-multiple last-dim path and bf16 compute.
    xb = jax.random.normal(jax.random.PRNGKey(1), (2, 8, 256), dtype=jnp.bfloat16)
    yb = gaussian_wavelet(xb)
    jax.block_until_ready(yb)
    yb_ref = _reference(xb)
    assert yb.shape == xb.shape and yb.dtype == xb.dtype
    assert jnp.allclose(
        yb.astype(jnp.float32), yb_ref.astype(jnp.float32), atol=1e-2, rtol=1e-2
    ), "bf16 mismatch vs reference"

    print("KERNEL_OK")
</pallas_src>

<mosaic_0001>
module attributes {stable_mosaic.version = 11 : i64} {
  func.func @_gaussian_wavelet_kernel(%arg0: i32, %arg1: i32, %arg2: memref<128x16xf32, #tpu.memory_space<vmem>>, %arg3: memref<128x16xf32, #tpu.memory_space<vmem>>) attributes {dimension_semantics = [#tpu.dimension_semantics<parallel>, #tpu.dimension_semantics<parallel>], iteration_bounds = array<i64: 1, 1>, scalar_prefetch = 0 : i64, scratch_operands = 0 : i64, tpu.core_type = #tpu.core_type<tc>, window_params = [{transform_indices = @transform_0, window_bounds = array<i64: 128, 16>}, {transform_indices = @transform_1, window_bounds = array<i64: 128, 16>}]} {
    %c0 = arith.constant 0 : index
    %c0_0 = arith.constant 0 : index
    %0 = vector.load %arg2[%c0, %c0_0] : memref<128x16xf32, #tpu.memory_space<vmem>>, vector<128x16xf32>
    %cst = arith.constant 0.000000e+00 : f32
    %1 = vector.broadcast %cst : f32 to vector<128x16xf32>
    %2 = arith.subf %1, %0 : vector<128x16xf32>
    %3 = arith.mulf %0, %0 : vector<128x16xf32>
    %cst_1 = arith.constant -5.000000e-01 : f32
    %4 = vector.broadcast %cst_1 : f32 to vector<128x16xf32>
    %5 = arith.mulf %3, %4 : vector<128x16xf32>
    %6 = math.exp %5 : vector<128x16xf32>
    %7 = arith.mulf %2, %6 : vector<128x16xf32>
    %c0_2 = arith.constant 0 : index
    %c0_3 = arith.constant 0 : index
    %8 = vector.load %arg3[%c0_2, %c0_3] : memref<128x16xf32, #tpu.memory_space<vmem>>, vector<128x16xf32>
    tpu.vector_store %arg3[%c0_2, %c0_3], %7 {strides = array<i32>} : memref<128x16xf32, #tpu.memory_space<vmem>>, vector<128x16xf32>,
    return
  }
  func.func @transform_0(%arg0: i32, %arg1: i32) -> (i32, i32) {
    %c0_i32 = arith.constant 0 : i32
    return %arg0, %arg1 : i32, i32
  }
  func.func @transform_1(%arg0: i32, %arg1: i32) -> (i32, i32) {
    %c0_i32 = arith.constant 0 : i32
    return %arg0, %arg1 : i32, i32
  }
}

</mosaic_0001>

<bundles_post_ra>
// kernel: gaussian_wavelet.1
= control target key start
LH: loop header
LB: loop body
LE: loop exit
PB: predicated region body
PF: predicated region fallthrough
CT: control target
= control target key end

     0   :  { %6 = vsyncpa [#allocation3], 0  ;;  %s378_s0 = inlined_call_operand.hbm [shape: f32[128,16], index: 0, kind: input, shape index: {}]   ;;  %s379_s1 = inlined_call_operand.hbm [shape: f32[128,16], index: 1, kind: output, shape index: {}]  }
   0x1   :  { %7 = vsyncpa [#allocation4], 0  ;;  %s12_s8 = sshll.u32 %s378_s0, 4  ;;  %s261_s9 = smov [#allocation2]   ;;  %s13_s8 = int_to_ptr.hbm [resolvable:$true] %s12_s8 }
   0x2   :  { %s14_s10 = sshll.u32 %s261_s9, 4  ;;  %s262_s11 = smov 128   ;;  %s15_s10 = int_to_ptr.vmem [resolvable:$true] %s14_s10 }
   0x3   :  { %s263_s12 = smov 8  }
   0x4   :  { %20 = dma.hbm_to_vmem [thread:$0]  %s13_s8, 2048, %s15_s10, [#allocation3], %s262_s11, %s262_s11, %s263_s12  }
   0x5   :  { %257 = dma.done.wait [#allocation3], 2048  }
   0x6   :  { %258 = vsyncadd [#allocation3], 4294965248  ;;  %v281_v0 = vld [vmem:[#allocation2] sm:$0xff]  ;;  %v283_v1 = vld [vmem:[#allocation2 + $0x8] sm:$0xff]  ;;  %vm137_vm0 = vcmask 130048   ;;  %s264_s0 = smov [#allocation5]  }
   0x7   :  { %v285_v2 = vld [vmem:[#allocation2 + $0x10] sm:$0xff]  ;;  %v57_v3 = vmul.f32 %v281_v0, %v281_v0  ;;  %v58_v4 = vmul.f32 %v283_v1, %v283_v1  ;;  %v291_v5 = vld [vmem:[#allocation2 + $0x18] sm:$0xff]  ;;  %v293_v6 = vld [vmem:[#allocation2 + $0x20] sm:$0xff]  ;;  %v41_v18 = vsub.f32 0.0, %v281_v0  ;;  %v42_v27 = vsub.f32 0.0, %v283_v1  ;;  %s158_s13 = sshll.u32 %s264_s0, 4  ;;  %s159_s13 = int_to_ptr.vmem [resolvable:$true] %s158_s13 }
   0x8   :  { %v295_v7 = vld [vmem:[#allocation2 + $0x28] sm:$0xff]  ;;  %v59_v8 = vmul.f32 %v285_v2, %v285_v2  ;;  %v60_v9 = vmul.f32 %v291_v5, %v291_v5  ;;  %v61_v12 = vmul.f32 %v293_v6, %v293_v6  ;;  %v303_v13 = vld [vmem:[#allocation2 + $0x30] sm:$0xff]  ;;  %v307_v17 = vld [vmem:[#allocation2 + $0x38] sm:$0xff]  ;;  %v43_v31 = vsub.f32 0.0, %v285_v2  ;;  %s160_s16 = sshll.u32 %s379_s1, 4  ;;  %s161_s16 = int_to_ptr.hbm [resolvable:$true] %s160_s16 }
   0x9   :  { %v73_v10 = vmul.f32 -0.5, %v57_v3  ;;  %v74_v11 = vmul.f32 -0.5, %v58_v4  ;;  %v62_v16 = vmul.f32 %v295_v7, %v295_v7  ;;  %v63_v25 = vmul.f32 %v303_v13, %v303_v13  ;;  %v312_v26 = vld [vmem:[#allocation2 + $0x40] sm:$0xff]  ;;  %v317_v30 = vld [vmem:[#allocation2 + $0x48] sm:$0xff]  ;;  %v320_v34 = vld [vmem:[#allocation2 + $0x50] sm:$0xff] }
   0xa   :  { %v75_v14 = vmul.f32 -0.5, %v59_v8  ;;  %v76_v15 = vmul.f32 -0.5, %v60_v9  ;;  %v77_v21 = vmul.f32 -0.5, %v61_v12  ;;  %v64_v29 = vmul.f32 %v307_v17, %v307_v17  ;;  %v325_v38 = vld [vmem:[#allocation2 + $0x58] sm:$0xff]  ;;  %v335_v48 = vld [vmem:[#allocation2 + $0x60] sm:$0xff]  ;;  %v338_v57 = vld [vmem:[#allocation2 + $0x68] sm:$0xff] }
   0xb   :  { %v89_v19 = vmul.f32 1.442695, %v73_v10  ;;  %v91_v20 = vmul.f32 1.442695, %v74_v11  ;;  %v78_v24 = vmul.f32 -0.5, %v62_v16  ;;  %v79_v33 = vmul.f32 -0.5, %v63_v25 }
   0xc   :  { %v93_v22 = vmul.f32 1.442695, %v75_v14  ;;  %v95_v23 = vmul.f32 1.442695, %v76_v15  ;;  %v97_v28 = vmul.f32 1.442695, %v77_v21  ;;  %v65_v37 = vmul.f32 %v312_v26, %v312_v26 }
   0xd   :  { %177 = vpow2.f32 %v89_v19  ;;  %v99_v32 = vmul.f32 1.442695, %v78_v24  ;;  %v44_v35 = vsub.f32 0.0, %v291_v5  ;;  %v80_v36 = vmul.f32 -0.5, %v64_v29  ;;  %v342_v62 = vld [vmem:[#allocation2 + $0x70] sm:$0xff] }
   0xe   :  { %179 = vpow2.f32 %v91_v20  ;;  %v45_v39 = vsub.f32 0.0, %v293_v6  ;;  %v101_v40 = vmul.f32 1.442695, %v79_v33  ;;  %v66_v41 = vmul.f32 %v317_v30, %v317_v30 }
   0xf   :  { %181 = vpow2.f32 %v93_v22  ;;  %v103_v42 = vmul.f32 1.442695, %v80_v36  ;;  %v81_v43 = vmul.f32 -0.5, %v65_v37  ;;  %v67_v44 = vmul.f32 %v320_v34, %v320_v34 }
  0x10   :  { %183 = vpow2.f32 %v95_v23  ;;  %v46_v45 = vsub.f32 0.0, %v295_v7  ;;  %v82_v46 = vmul.f32 -0.5, %v66_v41  ;;  %v68_v47 = vmul.f32 %v325_v38, %v325_v38  ;;  %v40_v7 = vld [vmem:[#allocation2 + $0x78] sm:$0xff] }
  0x11   :  { %185 = vpow2.f32 %v97_v28  ;;  %v47_v50 = vsub.f32 0.0, %v303_v13  ;;  %v105_v51 = vmul.f32 1.442695, %v81_v43  ;;  %v83_v52 = vmul.f32 -0.5, %v67_v44 }
  0x12   :  { %187 = vpow2.f32 %v99_v32  ;;  %v107_v55 = vmul.f32 1.442695, %v82_v46  ;;  %v84_v56 = vmul.f32 -0.5, %v68_v47  ;;  %v69_v61 = vmul.f32 %v335_v48, %v335_v48 }
  0x13   :  { %v178_v49 = vpop.eup %177  ;;  %189 = vpow2.f32 %v101_v40  ;;  %v109_v60 = vmul.f32 1.442695, %v83_v52  ;;  %v48_v1 = vsub.f32 0.0, %v307_v17  ;;  %v70_v6 = vmul.f32 %v338_v57, %v338_v57 }
  0x14   :  { %v180_v53 = vpop.eup %179  ;;  %v121_v54 = vmul.f32 %v178_v49, %v41_v18  ;;  %191 = vpow2.f32 %v103_v42  ;;  %v111_v2 = vmul.f32 1.442695, %v84_v56  ;;  %v85_v5 = vmul.f32 -0.5, %v69_v61 }
  0x15   :  { %v182_v58 = vpop.eup %181  ;;  %v122_v59 = vmul.f32 %v180_v53, %v42_v27  ;;  %193 = vpow2.f32 %v105_v51  ;;  %v49_v10 = vsub.f32 0.0, %v312_v26  ;;  %v71_v11 = vmul.f32 %v342_v62, %v342_v62 }
  0x16   :  { %v184_v63 = vpop.eup %183  ;;  %138 = vst.msk [vmem:[#allocation5] sm:$0xff] %vm137_vm0, %v121_v54  ;;  %v123_v0 = vmul.f32 %v182_v58, %v43_v31  ;;  %195 = vpow2.f32 %v107_v55  ;;  %v50_v14 = vsub.f32 0.0, %v317_v30  ;;  %v113_v15 = vmul.f32 1.442695, %v85_v5 }
  0x17   :  { %v186_v3 = vpop.eup %185  ;;  %139 = vst.msk [vmem:[#allocation5 + $0x8] sm:$0xff] %vm137_vm0, %v122_v59  ;;  %v124_v4 = vmul.f32 %v184_v63, %v44_v35  ;;  %197 = vpow2.f32 %v109_v60  ;;  %v86_v16 = vmul.f32 -0.5, %v70_v6  ;;  %v51_v19 = vsub.f32 0.0, %v320_v34 }
  0x18   :  { %v188_v8 = vpop.eup %187  ;;  %140 = vst.msk [vmem:[#allocation5 + $0x10] sm:$0xff] %vm137_vm0, %v123_v0  ;;  %v125_v9 = vmul.f32 %v186_v3, %v45_v39  ;;  %199 = vpow2.f32 %v111_v2  ;;  %v87_v20 = vmul.f32 -0.5, %v71_v11  ;;  %v72_v21 = vmul.f32 %v40_v7, %v40_v7 }
  0x19   :  { %v190_v12 = vpop.eup %189  ;;  %141 = vst.msk [vmem:[#allocation5 + $0x18] sm:$0xff] %vm137_vm0, %v124_v4  ;;  %v126_v13 = vmul.f32 %v188_v8, %v46_v45  ;;  %v52_v24 = vsub.f32 0.0, %v325_v38  ;;  %201 = vpow2.f32 %v113_v15  ;;  %v115_v25 = vmul.f32 1.442695, %v86_v16 }
  0x1a   :  { %v192_v17 = vpop.eup %191  ;;  %142 = vst.msk [vmem:[#allocation5 + $0x20] sm:$0xff] %vm137_vm0, %v125_v9  ;;  %v127_v18 = vmul.f32 %v190_v12, %v47_v50  ;;  %v117_v28 = vmul.f32 1.442695, %v87_v20  ;;  %v88_v29 = vmul.f32 -0.5, %v72_v21  ;;  %v53_v34 = vsub.f32 0.0, %v335_v48 }
  0x1b   :  { %v194_v22 = vpop.eup %193  ;;  %143 = vst.msk [vmem:[#allocation5 + $0x28] sm:$0xff] %vm137_vm0, %v126_v13  ;;  %v128_v23 = vmul.f32 %v192_v17, %v48_v1  ;;  %203 = vpow2.f32 %v115_v25  ;;  %v54_v37 = vsub.f32 0.0, %v338_v57  ;;  %v55_v39 = vsub.f32 0.0, %v342_v62 }
  0x1c   :  { %v196_v26 = vpop.eup %195  ;;  %144 = vst.msk [vmem:[#allocation5 + $0x30] sm:$0xff] %vm137_vm0, %v127_v18  ;;  %v129_v27 = vmul.f32 %v194_v22, %v49_v10  ;;  %205 = vpow2.f32 %v117_v28  ;;  %v119_v35 = vmul.f32 1.442695, %v88_v29  ;;  %v56_v42 = vsub.f32 0.0, %v40_v7 }
  0x1d   :  { %v198_v30 = vpop.eup %197  ;;  %145 = vst.msk [vmem:[#allocation5 + $0x38] sm:$0xff] %vm137_vm0, %v128_v23  ;;  %v130_v31 = vmul.f32 %v196_v26, %v50_v14 }
  0x1e   :  { %v200_v32 = vpop.eup %199  ;;  %146 = vst.msk [vmem:[#allocation5 + $0x40] sm:$0xff] %vm137_vm0, %v129_v27  ;;  %v131_v33 = vmul.f32 %v198_v30, %v51_v19  ;;  %207 = vpow2.f32 %v119_v35 }
  0x1f   :  { %147 = vst.msk [vmem:[#allocation5 + $0x48] sm:$0xff] %vm137_vm0, %v130_v31  ;;  %v132_v36 = vmul.f32 %v200_v32, %v52_v24  ;;  %v202_v38 = vpop.eup %201 }
  0x20   :  { %148 = vst.msk [vmem:[#allocation5 + $0x50] sm:$0xff] %vm137_vm0, %v131_v33  ;;  %v133_v40 = vmul.f32 %v202_v38, %v53_v34 }
  0x21   :  { %149 = vst.msk [vmem:[#allocation5 + $0x58] sm:$0xff] %vm137_vm0, %v132_v36  ;;  %v204_v41 = vpop.eup %203 }
  0x22   :  { %v206_v43 = vpop.eup %205  ;;  %150 = vst.msk [vmem:[#allocation5 + $0x60] sm:$0xff] %vm137_vm0, %v133_v40  ;;  %v134_v44 = vmul.f32 %v204_v41, %v54_v37 }
  0x23   :  { %v135_v45 = vmul.f32 %v206_v43, %v55_v39 }
  0x24   :  { %v208_v46 = vpop.eup %207  ;;  %151 = vst.msk [vmem:[#allocation5 + $0x68] sm:$0xff] %vm137_vm0, %v134_v44 }
  0x25   :  { %152 = vst.msk [vmem:[#allocation5 + $0x70] sm:$0xff] %vm137_vm0, %v135_v45  ;;  %v136_v47 = vmul.f32 %v208_v46, %v56_v42 }
  0x27   :  { %153 = vst.msk [vmem:[#allocation5 + $0x78] sm:$0xff] %vm137_vm0, %v136_v47 }
  0x28   :  { %166 = dma.vmem_to_hbm [thread:$0]  %s159_s13, 2048, %s161_s16, [#allocation4], %s262_s11, %s262_s11, %s263_s12  }
  0x29   :  { %259 = dma.done.wait [#allocation4], 2048  }
  0x2a   :  { %260 = vsyncadd [#allocation4], 4294965248 }
  0x2b   :  { %171 = vsyncpa [#allocation3], 1 }
  0x2c   :  { %172 = vsyncpa [#allocation4], 1 }

</bundles_post_ra>
